<compile_context>
chip_gen: v7x
topology: tpu7x:2x2x1
jax: 0.10.0
libtpu: 0.0.40
codegen_flags: <defaults>
</compile_context>

<pallas_src>
import jax
import jax.numpy as jnp
import numpy as np
from jax import lax
from jax.experimental import pallas as pl
from jax.experimental.pallas import tpu as pltpu

# ----------------------------- sizes (small, consistent with the module) ----
B = 8        # batch
T = 8        # sequence length
D = 128      # input_size   (module default 1000; shrunk for a small runnable demo)
H = 32       # hidden_size  (module default 100)
O = 2        # out_size
OPAD = 128   # lane-dense padded output width (wrapper slices back to O)


def lstm_head_kernel(x_ref, wih_ref, whh_ref, b_ref, w2_ref, b2_ref, out_ref):
    """Full IntRamLSTM forward in one kernel invocation.

    x_ref   : (T*B, D)   f32   time-major rows: rows [t*B, (t+1)*B) are timestep t
    wih_ref : (D, 4H)    f32   transposed weight_ih_l0, i/f/o columns pre-scaled by 0.5
    whh_ref : (H, 4H)    f32   transposed weight_hh_l0, i/f/o columns pre-scaled by 0.5
    b_ref   : (1, 4H)    f32   (bias_ih + bias_hh), i/f/o entries pre-scaled by 0.5
    w2_ref  : (H, OPAD)  f32   transposed linear2.weight, zero-padded to 128 lanes
    b2_ref  : (1, OPAD)  f32   linear2.bias, zero-padded
    out_ref : (B, OPAD)  f32   lane-dense; real output in columns [0, O)
    """
    Bn = out_ref.shape[0]
    Tn = x_ref.shape[0] // Bn
    Hn = whh_ref.shape[0]
    G = 4 * Hn

    whh = whh_ref[...]                               # (H, 4H), resident across steps

    # ---- Hoisted input projection: ONE dense (T*B, D) @ (D, 4H) MXU matmul + bias ----
    gx = (jnp.dot(x_ref[...], wih_ref[...], preferred_element_type=jnp.float32)
          + b_ref[...])                              # (T*B, 4H), pre-scaled gate inputs

    # Hoisted per-lane affine that turns one tanh pass into all four gate activations:
    #   g lanes  ([2H,3H)) : act = tanh(pre)                      -> mul 1.0, add 0.0
    #   i/f/o lanes        : act = sigmoid(2*pre_s) = 0.5+0.5*tanh -> mul 0.5, add 0.5
    # (broadcasts are hoisted because JAX does not CSE broadcast_in_dim inside the loop)
    lane = lax.broadcasted_iota(jnp.int32, (Bn, G), 1)
    is_g = (lane >= 2 * Hn) & (lane < 3 * Hn)
    gmul = jnp.where(is_g, 1.0, 0.5).astype(jnp.float32)   # (B, 4H)
    gadd = jnp.where(is_g, 0.0, 0.5).astype(jnp.float32)   # (B, 4H)

    h = jnp.zeros((Bn, Hn), jnp.float32)
    c = jnp.zeros((Bn, Hn), jnp.float32)

    # ---- Statically unrolled recurrence over the fixed, short T (serial dep: h, c) ----
    for t in range(Tn):
        pre = (gx[t * Bn:(t + 1) * Bn, :]
               + jnp.dot(h, whh, preferred_element_type=jnp.float32))   # (B, 4H) scaled
        # Single EUP pass: one tanh over the dense (B, 128) vreg, then a per-lane FMA.
        act = jnp.tanh(pre) * gmul + gadd
        # PyTorch gate order: i, f, g, o (lane slices land on the XLU slot, idle here).
        i_g = act[:, 0 * Hn:1 * Hn]
        f_g = act[:, 1 * Hn:2 * Hn]
        g_g = act[:, 2 * Hn:3 * Hn]
        o_g = act[:, 3 * Hn:4 * Hn]
        c = f_g * c + i_g * g_g
        h = o_g * jnp.tanh(c)

    relu_h = jnp.maximum(h, 0.0)                      # ReLU on out[:, -1, :]
    # TODO(synk): self.do(out) in the reference module discards its result -> intentionally no dropout.
    out_ref[...] = (jnp.dot(relu_h, w2_ref[...], preferred_element_type=jnp.float32)
                    + b2_ref[...]).astype(out_ref.dtype)   # lane-dense linear2 (padded)


def prepare_params(w_ih, w_hh, b_ih, b_hh, w2, b2):
    """One-time parameter preprocessing (kept OUT of the per-call path).

    Folds the sigmoid half-argument scaling (exact power-of-two scale) into the
    i/f/o-gate columns of the LSTM weights and bias, transposes for lane-dense
    matmuls, and zero-pads the head to 128 output lanes.
    """
    gate_scale = np.full((4 * H,), 0.5, np.float32)
    gate_scale[2 * H:3 * H] = 1.0                               # g gate (tanh) unscaled
    gate_scale = jnp.asarray(gate_scale)

    wih_t = jnp.asarray(w_ih, jnp.float32).T * gate_scale[None, :]        # (D, 4H)
    whh_t = jnp.asarray(w_hh, jnp.float32).T * gate_scale[None, :]        # (H, 4H)
    bias = ((b_ih + b_hh).astype(jnp.float32) * gate_scale).reshape(1, 4 * H)
    w2_pad = jnp.zeros((H, OPAD), jnp.float32).at[:, :O].set(
        jnp.asarray(w2, jnp.float32).T)                                    # (H, OPAD)
    b2_pad = jnp.zeros((1, OPAD), jnp.float32).at[0, :O].set(
        jnp.asarray(b2, jnp.float32))                                      # (1, OPAD)
    return wih_t, whh_t, bias, w2_pad, b2_pad


@jax.jit
def int_ram_lstm_forward(seq, wih_t, whh_t, bias, w2_pad, b2_pad):
    """seq: (B, T, D) float32 (batch_first, same as the PyTorch module)."""
    # Time-major flatten so the hoisted input projection is one (T*B, D) matmul
    # and per-step gate rows are contiguous, sublane-tile-aligned blocks.
    x_flat = jnp.transpose(seq, (1, 0, 2)).reshape(T * B, D).astype(jnp.float32)

    out_pad = pl.pallas_call(
        lstm_head_kernel,
        out_shape=jax.ShapeDtypeStruct((B, OPAD), jnp.float32),
        grid=(1,),
        in_specs=[
            pl.BlockSpec((T * B, D), lambda i: (0, 0)),
            pl.BlockSpec((D, 4 * H), lambda i: (0, 0)),
            pl.BlockSpec((H, 4 * H), lambda i: (0, 0)),
            pl.BlockSpec((1, 4 * H), lambda i: (0, 0)),
            pl.BlockSpec((H, OPAD), lambda i: (0, 0)),
            pl.BlockSpec((1, OPAD), lambda i: (0, 0)),
        ],
        out_specs=pl.BlockSpec((B, OPAD), lambda i: (0, 0)),
        compiler_params=pltpu.CompilerParams(
            dimension_semantics=("arbitrary",)),
    )(x_flat, wih_t, whh_t, bias, w2_pad, b2_pad)

    return out_pad[:, :O]


def reference_forward(seq, w_ih, w_hh, b_ih, b_hh, w2, b2):
    """Pure-JAX reference (same math as nn.LSTM + head), for correctness check."""
    h = jnp.zeros((B, H), jnp.float32)
    c = jnp.zeros((B, H), jnp.float32)
    for t in range(T):
        x_t = seq[:, t, :]
        gates = x_t @ w_ih.T + b_ih + h @ w_hh.T + b_hh
        i_g = jax.nn.sigmoid(gates[:, 0 * H:1 * H])
        f_g = jax.nn.sigmoid(gates[:, 1 * H:2 * H])
        g_g = jnp.tanh(gates[:, 2 * H:3 * H])
        o_g = jax.nn.sigmoid(gates[:, 3 * H:4 * H])
        c = f_g * c + i_g * g_g
        h = o_g * jnp.tanh(c)
    return jnp.maximum(h, 0.0) @ w2.T + b2


if __name__ == "__main__":
    key = jax.random.PRNGKey(0)
    ks = jax.random.split(key, 8)

    # Deterministic parameter init, PyTorch-style U(-1/sqrt(H), 1/sqrt(H)).
    bound = 1.0 / np.sqrt(H)
    w_ih = jax.random.uniform(ks[0], (4 * H, D), jnp.float32, -bound, bound)
    w_hh = jax.random.uniform(ks[1], (4 * H, H), jnp.float32, -bound, bound)
    b_ih = jax.random.uniform(ks[2], (4 * H,), jnp.float32, -bound, bound)
    b_hh = jax.random.uniform(ks[3], (4 * H,), jnp.float32, -bound, bound)
    w2 = jax.random.uniform(ks[4], (O, H), jnp.float32, -bound, bound)
    b2 = jax.random.uniform(ks[5], (O,), jnp.float32, -bound, bound)

    seq = jax.random.normal(ks[6], (B, T, D), jnp.float32)   # (batch, time, features)

    # One-time parameter setup (not on the per-call path).
    params = prepare_params(w_ih, w_hh, b_ih, b_hh, w2, b2)
    params = jax.tree_util.tree_map(jax.block_until_ready, params)

    out = int_ram_lstm_forward(seq, *params)
    out = jax.block_until_ready(out)

    ref = reference_forward(seq, w_ih, w_hh, b_ih, b_hh, w2, b2)
    np.testing.assert_allclose(np.asarray(out), np.asarray(ref), rtol=2e-4, atol=2e-5)

    print("KERNEL_OK")
</pallas_src>

<mosaic_0001>
module attributes {stable_mosaic.version = 11 : i64} {
  func.func @lstm_head_kernel(%arg0: i32, %arg1: memref<64x128xf32, #tpu.memory_space<vmem>>, %arg2: memref<128x128xf32, #tpu.memory_space<vmem>>, %arg3: memref<32x128xf32, #tpu.memory_space<vmem>>, %arg4: memref<1x128xf32, #tpu.memory_space<vmem>>, %arg5: memref<32x128xf32, #tpu.memory_space<vmem>>, %arg6: memref<1x128xf32, #tpu.memory_space<vmem>>, %arg7: memref<8x128xf32, #tpu.memory_space<vmem>>) attributes {dimension_semantics = [#tpu.dimension_semantics<arbitrary>], iteration_bounds = array<i64: 1>, scalar_prefetch = 0 : i64, scratch_operands = 0 : i64, tpu.core_type = #tpu.core_type<tc>, window_params = [{pipeline_mode = #tpu.pipeline_mode<synchronous>, transform_indices = @transform_0, window_bounds = array<i64: 64, 128>}, {pipeline_mode = #tpu.pipeline_mode<synchronous>, transform_indices = @transform_1, window_bounds = array<i64: 128, 128>}, {pipeline_mode = #tpu.pipeline_mode<synchronous>, transform_indices = @transform_2, window_bounds = array<i64: 32, 128>}, {pipeline_mode = #tpu.pipeline_mode<synchronous>, transform_indices = @transform_3, window_bounds = array<i64: 1, 128>}, {pipeline_mode = #tpu.pipeline_mode<synchronous>, transform_indices = @transform_4, window_bounds = array<i64: 32, 128>}, {pipeline_mode = #tpu.pipeline_mode<synchronous>, transform_indices = @transform_5, window_bounds = array<i64: 1, 128>}, {pipeline_mode = #tpu.pipeline_mode<synchronous>, transform_indices = @transform_6, window_bounds = array<i64: 8, 128>}]} {
    %c0 = arith.constant 0 : index
    %c0_0 = arith.constant 0 : index
    %0 = vector.load %arg3[%c0, %c0_0] : memref<32x128xf32, #tpu.memory_space<vmem>>, vector<32x128xf32>
    %c0_1 = arith.constant 0 : index
    %c0_2 = arith.constant 0 : index
    %1 = vector.load %arg1[%c0_1, %c0_2] : memref<64x128xf32, #tpu.memory_space<vmem>>, vector<64x128xf32>
    %c0_3 = arith.constant 0 : index
    %c0_4 = arith.constant 0 : index
    %2 = vector.load %arg2[%c0_3, %c0_4] : memref<128x128xf32, #tpu.memory_space<vmem>>, vector<128x128xf32>
    %cst = arith.constant dense<0.000000e+00> : vector<64x128xf32>
    %3 = tpu.matmul %1, %2, %cst {dimension_numbers = #tpu.dot_dimension_numbers<[1], [0], [0], [1], [0, 0, 1, 1], [], []>} : vector<64x128xf32>, vector<128x128xf32>, vector<64x128xf32> -> vector<64x128xf32>
    %c0_5 = arith.constant 0 : index
    %c0_6 = arith.constant 0 : index
    %4 = vector.load %arg4[%c0_5, %c0_6] : memref<1x128xf32, #tpu.memory_space<vmem>>, vector<1x128xf32>
    %5 = vector.broadcast %4 : vector<1x128xf32> to vector<64x128xf32>
    %6 = arith.addf %3, %5 : vector<64x128xf32>
    %7 = tpu.iota {dimensions = array<i32: 1>} : vector<8x128xi32>
    %c64_i32 = arith.constant 64 : i32
    %8 = vector.broadcast %c64_i32 : i32 to vector<8x128xi32>
    %9 = arith.cmpi sge, %7, %8 : vector<8x128xi32>
    %c96_i32 = arith.constant 96 : i32
    %10 = vector.broadcast %c96_i32 : i32 to vector<8x128xi32>
    %11 = arith.cmpi slt, %7, %10 : vector<8x128xi32>
    %12 = arith.andi %9, %11 : vector<8x128xi1>
    %cst_7 = arith.constant 1.000000e+00 : f32
    %cst_8 = arith.constant 5.000000e-01 : f32
    %13 = vector.broadcast %cst_7 : f32 to vector<8x128xf32>
    %14 = vector.broadcast %cst_8 : f32 to vector<8x128xf32>
    %15 = arith.select %12, %13, %14 : vector<8x128xi1>, vector<8x128xf32>
    %cst_9 = arith.constant 0.000000e+00 : f32
    %cst_10 = arith.constant 5.000000e-01 : f32
    %16 = vector.broadcast %cst_9 : f32 to vector<8x128xf32>
    %17 = vector.broadcast %cst_10 : f32 to vector<8x128xf32>
    %18 = arith.select %12, %16, %17 : vector<8x128xi1>, vector<8x128xf32>
    %cst_11 = arith.constant 0.000000e+00 : f32
    %19 = vector.broadcast %cst_11 : f32 to vector<8x32xf32>
    %cst_12 = arith.constant 0.000000e+00 : f32
    %20 = vector.broadcast %cst_12 : f32 to vector<8x32xf32>
    %21 = vector.extract_strided_slice %6 {offsets = [0, 0], sizes = [8, 128], strides = [1, 1]} : vector<64x128xf32> to vector<8x128xf32>
    %cst_13 = arith.constant dense<0.000000e+00> : vector<8x128xf32>
    %22 = tpu.matmul %19, %0, %cst_13 {dimension_numbers = #tpu.dot_dimension_numbers<[1], [0], [0], [1], [0, 0, 1, 1], [], []>} : vector<8x32xf32>, vector<32x128xf32>, vector<8x128xf32> -> vector<8x128xf32>
    %23 = arith.addf %21, %22 : vector<8x128xf32>
    %24 = math.tanh %23 : vector<8x128xf32>
    %25 = arith.mulf %24, %15 : vector<8x128xf32>
    %26 = arith.addf %25, %18 : vector<8x128xf32>
    %27 = vector.extract_strided_slice %26 {offsets = [0, 0], sizes = [8, 32], strides = [1, 1]} : vector<8x128xf32> to vector<8x32xf32>
    %28 = vector.extract_strided_slice %26 {offsets = [0, 32], sizes = [8, 32], strides = [1, 1]} : vector<8x128xf32> to vector<8x32xf32>
    %29 = vector.extract_strided_slice %26 {offsets = [0, 64], sizes = [8, 32], strides = [1, 1]} : vector<8x128xf32> to vector<8x32xf32>
    %30 = vector.extract_strided_slice %26 {offsets = [0, 96], sizes = [8, 32], strides = [1, 1]} : vector<8x128xf32> to vector<8x32xf32>
    %31 = arith.mulf %28, %20 : vector<8x32xf32>
    %32 = arith.mulf %27, %29 : vector<8x32xf32>
    %33 = arith.addf %31, %32 : vector<8x32xf32>
    %34 = math.tanh %33 : vector<8x32xf32>
    %35 = arith.mulf %30, %34 : vector<8x32xf32>
    %36 = vector.extract_strided_slice %6 {offsets = [8, 0], sizes = [8, 128], strides = [1, 1]} : vector<64x128xf32> to vector<8x128xf32>
    %cst_14 = arith.constant dense<0.000000e+00> : vector<8x128xf32>
    %37 = tpu.matmul %35, %0, %cst_14 {dimension_numbers = #tpu.dot_dimension_numbers<[1], [0], [0], [1], [0, 0, 1, 1], [], []>} : vector<8x32xf32>, vector<32x128xf32>, vector<8x128xf32> -> vector<8x128xf32>
    %38 = arith.addf %36, %37 : vector<8x128xf32>
    %39 = math.tanh %38 : vector<8x128xf32>
    %40 = arith.mulf %39, %15 : vector<8x128xf32>
    %41 = arith.addf %40, %18 : vector<8x128xf32>
    %42 = vector.extract_strided_slice %41 {offsets = [0, 0], sizes = [8, 32], strides = [1, 1]} : vector<8x128xf32> to vector<8x32xf32>
    %43 = vector.extract_strided_slice %41 {offsets = [0, 32], sizes = [8, 32], strides = [1, 1]} : vector<8x128xf32> to vector<8x32xf32>
    %44 = vector.extract_strided_slice %41 {offsets = [0, 64], sizes = [8, 32], strides = [1, 1]} : vector<8x128xf32> to vector<8x32xf32>
    %45 = vector.extract_strided_slice %41 {offsets = [0, 96], sizes = [8, 32], strides = [1, 1]} : vector<8x128xf32> to vector<8x32xf32>
    %46 = arith.mulf %43, %33 : vector<8x32xf32>
    %47 = arith.mulf %42, %44 : vector<8x32xf32>
    %48 = arith.addf %46, %47 : vector<8x32xf32>
    %49 = math.tanh %48 : vector<8x32xf32>
    %50 = arith.mulf %45, %49 : vector<8x32xf32>
    %51 = vector.extract_strided_slice %6 {offsets = [16, 0], sizes = [8, 128], strides = [1, 1]} : vector<64x128xf32> to vector<8x128xf32>
    %cst_15 = arith.constant dense<0.000000e+00> : vector<8x128xf32>
    %52 = tpu.matmul %50, %0, %cst_15 {dimension_numbers = #tpu.dot_dimension_numbers<[1], [0], [0], [1], [0, 0, 1, 1], [], []>} : vector<8x32xf32>, vector<32x128xf32>, vector<8x128xf32> -> vector<8x128xf32>
    %53 = arith.addf %51, %52 : vector<8x128xf32>
    %54 = math.tanh %53 : vector<8x128xf32>
    %55 = arith.mulf %54, %15 : vector<8x128xf32>
    %56 = arith.addf %55, %18 : vector<8x128xf32>
    %57 = vector.extract_strided_slice %56 {offsets = [0, 0], sizes = [8, 32], strides = [1, 1]} : vector<8x128xf32> to vector<8x32xf32>
    %58 = vector.extract_strided_slice %56 {offsets = [0, 32], sizes = [8, 32], strides = [1, 1]} : vector<8x128xf32> to vector<8x32xf32>
    %59 = vector.extract_strided_slice %56 {offsets = [0, 64], sizes = [8, 32], strides = [1, 1]} : vector<8x128xf32> to vector<8x32xf32>
    %60 = vector.extract_strided_slice %56 {offsets = [0, 96], sizes = [8, 32], strides = [1, 1]} : vector<8x128xf32> to vector<8x32xf32>
    %61 = arith.mulf %58, %48 : vector<8x32xf32>
    %62 = arith.mulf %57, %59 : vector<8x32xf32>
    %63 = arith.addf %61, %62 : vector<8x32xf32>
    %64 = math.tanh %63 : vector<8x32xf32>
    %65 = arith.mulf %60, %64 : vector<8x32xf32>
    %66 = vector.extract_strided_slice %6 {offsets = [24, 0], sizes = [8, 128], strides = [1, 1]} : vector<64x128xf32> to vector<8x128xf32>
    %cst_16 = arith.constant dense<0.000000e+00> : vector<8x128xf32>
    %67 = tpu.matmul %65, %0, %cst_16 {dimension_numbers = #tpu.dot_dimension_numbers<[1], [0], [0], [1], [0, 0, 1, 1], [], []>} : vector<8x32xf32>, vector<32x128xf32>, vector<8x128xf32> -> vector<8x128xf32>
    %68 = arith.addf %66, %67 : vector<8x128xf32>
    %69 = math.tanh %68 : vector<8x128xf32>
    %70 = arith.mulf %69, %15 : vector<8x128xf32>
    %71 = arith.addf %70, %18 : vector<8x128xf32>
    %72 = vector.extract_strided_slice %71 {offsets = [0, 0], sizes = [8, 32], strides = [1, 1]} : vector<8x128xf32> to vector<8x32xf32>
    %73 = vector.extract_strided_slice %71 {offsets = [0, 32], sizes = [8, 32], strides = [1, 1]} : vector<8x128xf32> to vector<8x32xf32>
    %74 = vector.extract_strided_slice %71 {offsets = [0, 64], sizes = [8, 32], strides = [1, 1]} : vector<8x128xf32> to vector<8x32xf32>
    %75 = vector.extract_strided_slice %71 {offsets = [0, 96], sizes = [8, 32], strides = [1, 1]} : vector<8x128xf32> to vector<8x32xf32>
    %76 = arith.mulf %73, %63 : vector<8x32xf32>
    %77 = arith.mulf %72, %74 : vector<8x32xf32>
    %78 = arith.addf %76, %77 : vector<8x32xf32>
    %79 = math.tanh %78 : vector<8x32xf32>
    %80 = arith.mulf %75, %79 : vector<8x32xf32>
    %81 = vector.extract_strided_slice %6 {offsets = [32, 0], sizes = [8, 128], strides = [1, 1]} : vector<64x128xf32> to vector<8x128xf32>
    %cst_17 = arith.constant dense<0.000000e+00> : vector<8x128xf32>
    %82 = tpu.matmul %80, %0, %cst_17 {dimension_numbers = #tpu.dot_dimension_numbers<[1], [0], [0], [1], [0, 0, 1, 1], [], []>} : vector<8x32xf32>, vector<32x128xf32>, vector<8x128xf32> -> vector<8x128xf32>
    %83 = arith.addf %81, %82 : vector<8x128xf32>
    %84 = math.tanh %83 : vector<8x128xf32>
    %85 = arith.mulf %84, %15 : vector<8x128xf32>
    %86 = arith.addf %85, %18 : vector<8x128xf32>
    %87 = vector.extract_strided_slice %86 {offsets = [0, 0], sizes = [8, 32], strides = [1, 1]} : vector<8x128xf32> to vector<8x32xf32>
    %88 = vector.extract_strided_slice %86 {offsets = [0, 32], sizes = [8, 32], strides = [1, 1]} : vector<8x128xf32> to vector<8x32xf32>
    %89 = vector.extract_strided_slice %86 {offsets = [0, 64], sizes = [8, 32], strides = [1, 1]} : vector<8x128xf32> to vector<8x32xf32>
    %90 = vector.extract_strided_slice %86 {offsets = [0, 96], sizes = [8, 32], strides = [1, 1]} : vector<8x128xf32> to vector<8x32xf32>
    %91 = arith.mulf %88, %78 : vector<8x32xf32>
    %92 = arith.mulf %87, %89 : vector<8x32xf32>
    %93 = arith.addf %91, %92 : vector<8x32xf32>
    %94 = math.tanh %93 : vector<8x32xf32>
    %95 = arith.mulf %90, %94 : vector<8x32xf32>
    %96 = vector.extract_strided_slice %6 {offsets = [40, 0], sizes = [8, 128], strides = [1, 1]} : vector<64x128xf32> to vector<8x128xf32>
    %cst_18 = arith.constant dense<0.000000e+00> : vector<8x128xf32>
    %97 = tpu.matmul %95, %0, %cst_18 {dimension_numbers = #tpu.dot_dimension_numbers<[1], [0], [0], [1], [0, 0, 1, 1], [], []>} : vector<8x32xf32>, vector<32x128xf32>, vector<8x128xf32> -> vector<8x128xf32>
    %98 = arith.addf %96, %97 : vector<8x128xf32>
    %99 = math.tanh %98 : vector<8x128xf32>
    %100 = arith.mulf %99, %15 : vector<8x128xf32>
    %101 = arith.addf %100, %18 : vector<8x128xf32>
    %102 = vector.extract_strided_slice %101 {offsets = [0, 0], sizes = [8, 32], strides = [1, 1]} : vector<8x128xf32> to vector<8x32xf32>
    %103 = vector.extract_strided_slice %101 {offsets = [0, 32], sizes = [8, 32], strides = [1, 1]} : vector<8x128xf32> to vector<8x32xf32>
    %104 = vector.extract_strided_slice %101 {offsets = [0, 64], sizes = [8, 32], strides = [1, 1]} : vector<8x128xf32> to vector<8x32xf32>
    %105 = vector.extract_strided_slice %101 {offsets = [0, 96], sizes = [8, 32], strides = [1, 1]} : vector<8x128xf32> to vector<8x32xf32>
    %106 = arith.mulf %103, %93 : vector<8x32xf32>
    %107 = arith.mulf %102, %104 : vector<8x32xf32>
    %108 = arith.addf %106, %107 : vector<8x32xf32>
    %109 = math.tanh %108 : vector<8x32xf32>
    %110 = arith.mulf %105, %109 : vector<8x32xf32>
    %111 = vector.extract_strided_slice %6 {offsets = [48, 0], sizes = [8, 128], strides = [1, 1]} : vector<64x128xf32> to vector<8x128xf32>
    %cst_19 = arith.constant dense<0.000000e+00> : vector<8x128xf32>
    %112 = tpu.matmul %110, %0, %cst_19 {dimension_numbers = #tpu.dot_dimension_numbers<[1], [0], [0], [1], [0, 0, 1, 1], [], []>} : vector<8x32xf32>, vector<32x128xf32>, vector<8x128xf32> -> vector<8x128xf32>
    %113 = arith.addf %111, %112 : vector<8x128xf32>
    %114 = math.tanh %113 : vector<8x128xf32>
    %115 = arith.mulf %114, %15 : vector<8x128xf32>
    %116 = arith.addf %115, %18 : vector<8x128xf32>
    %117 = vector.extract_strided_slice %116 {offsets = [0, 0], sizes = [8, 32], strides = [1, 1]} : vector<8x128xf32> to vector<8x32xf32>
    %118 = vector.extract_strided_slice %116 {offsets = [0, 32], sizes = [8, 32], strides = [1, 1]} : vector<8x128xf32> to vector<8x32xf32>
    %119 = vector.extract_strided_slice %116 {offsets = [0, 64], sizes = [8, 32], strides = [1, 1]} : vector<8x128xf32> to vector<8x32xf32>
    %120 = vector.extract_strided_slice %116 {offsets = [0, 96], sizes = [8, 32], strides = [1, 1]} : vector<8x128xf32> to vector<8x32xf32>
    %121 = arith.mulf %118, %108 : vector<8x32xf32>
    %122 = arith.mulf %117, %119 : vector<8x32xf32>
    %123 = arith.addf %121, %122 : vector<8x32xf32>
    %124 = math.tanh %123 : vector<8x32xf32>
    %125 = arith.mulf %120, %124 : vector<8x32xf32>
    %126 = vector.extract_strided_slice %6 {offsets = [56, 0], sizes = [8, 128], strides = [1, 1]} : vector<64x128xf32> to vector<8x128xf32>
    %cst_20 = arith.constant dense<0.000000e+00> : vector<8x128xf32>
    %127 = tpu.matmul %125, %0, %cst_20 {dimension_numbers = #tpu.dot_dimension_numbers<[1], [0], [0], [1], [0, 0, 1, 1], [], []>} : vector<8x32xf32>, vector<32x128xf32>, vector<8x128xf32> -> vector<8x128xf32>
    %128 = arith.addf %126, %127 : vector<8x128xf32>
    %129 = math.tanh %128 : vector<8x128xf32>
    %130 = arith.mulf %129, %15 : vector<8x128xf32>
    %131 = arith.addf %130, %18 : vector<8x128xf32>
    %132 = vector.extract_strided_slice %131 {offsets = [0, 0], sizes = [8, 32], strides = [1, 1]} : vector<8x128xf32> to vector<8x32xf32>
    %133 = vector.extract_strided_slice %131 {offsets = [0, 32], sizes = [8, 32], strides = [1, 1]} : vector<8x128xf32> to vector<8x32xf32>
    %134 = vector.extract_strided_slice %131 {offsets = [0, 64], sizes = [8, 32], strides = [1, 1]} : vector<8x128xf32> to vector<8x32xf32>
    %135 = vector.extract_strided_slice %131 {offsets = [0, 96], sizes = [8, 32], strides = [1, 1]} : vector<8x128xf32> to vector<8x32xf32>
    %136 = arith.mulf %133, %123 : vector<8x32xf32>
    %137 = arith.mulf %132, %134 : vector<8x32xf32>
    %138 = arith.addf %136, %137 : vector<8x32xf32>
    %139 = math.tanh %138 : vector<8x32xf32>
    %140 = arith.mulf %135, %139 : vector<8x32xf32>
    %cst_21 = arith.constant 0.000000e+00 : f32
    %141 = vector.broadcast %cst_21 : f32 to vector<8x32xf32>
    %142 = arith.maximumf %140, %141 : vector<8x32xf32>
    %c0_22 = arith.constant 0 : index
    %c0_23 = arith.constant 0 : index
    %143 = vector.load %arg5[%c0_22, %c0_23] : memref<32x128xf32, #tpu.memory_space<vmem>>, vector<32x128xf32>
    %cst_24 = arith.constant dense<0.000000e+00> : vector<8x128xf32>
    %144 = tpu.matmul %142, %143, %cst_24 {dimension_numbers = #tpu.dot_dimension_numbers<[1], [0], [0], [1], [0, 0, 1, 1], [], []>} : vector<8x32xf32>, vector<32x128xf32>, vector<8x128xf32> -> vector<8x128xf32>
    %c0_25 = arith.constant 0 : index
    %c0_26 = arith.constant 0 : index
    %145 = vector.load %arg6[%c0_25, %c0_26] : memref<1x128xf32, #tpu.memory_space<vmem>>, vector<1x128xf32>
    %146 = vector.broadcast %145 : vector<1x128xf32> to vector<8x128xf32>
    %147 = arith.addf %144, %146 : vector<8x128xf32>
    %c0_27 = arith.constant 0 : index
    %c0_28 = arith.constant 0 : index
    %148 = vector.load %arg7[%c0_27, %c0_28] : memref<8x128xf32, #tpu.memory_space<vmem>>, vector<8x128xf32>
    tpu.vector_store %arg7[%c0_27, %c0_28], %147 {strides = array<i32>} : memref<8x128xf32, #tpu.memory_space<vmem>>, vector<8x128xf32>,
    return
  }
  func.func @transform_0(%arg0: i32) -> (i32, i32) {
    %c0_i32 = arith.constant 0 : i32
    %c0_i32_0 = arith.constant 0 : i32
    %c0_i32_1 = arith.constant 0 : i32
    return %c0_i32, %c0_i32_0 : i32, i32
  }
  func.func @transform_1(%arg0: i32) -> (i32, i32) {
    %c0_i32 = arith.constant 0 : i32
    %c0_i32_0 = arith.constant 0 : i32
    %c0_i32_1 = arith.constant 0 : i32
    return %c0_i32, %c0_i32_0 : i32, i32
  }
  func.func @transform_2(%arg0: i32) -> (i32, i32) {
    %c0_i32 = arith.constant 0 : i32
    %c0_i32_0 = arith.constant 0 : i32
    %c0_i32_1 = arith.constant 0 : i32
    return %c0_i32, %c0_i32_0 : i32, i32
  }
  func.func @transform_3(%arg0: i32) -> (i32, i32) {
    %c0_i32 = arith.constant 0 : i32
    %c0_i32_0 = arith.constant 0 : i32
    %c0_i32_1 = arith.constant 0 : i32
    return %c0_i32, %c0_i32_0 : i32, i32
  }
  func.func @transform_4(%arg0: i32) -> (i32, i32) {
    %c0_i32 = arith.constant 0 : i32
    %c0_i32_0 = arith.constant 0 : i32
    %c0_i32_1 = arith.constant 0 : i32
    return %c0_i32, %c0_i32_0 : i32, i32
  }
  func.func @transform_5(%arg0: i32) -> (i32, i32) {
    %c0_i32 = arith.constant 0 : i32
    %c0_i32_0 = arith.constant 0 : i32
    %c0_i32_1 = arith.constant 0 : i32
    return %c0_i32, %c0_i32_0 : i32, i32
  }
  func.func @transform_6(%arg0: i32) -> (i32, i32) {
    %c0_i32 = arith.constant 0 : i32
    %c0_i32_0 = arith.constant 0 : i32
    %c0_i32_1 = arith.constant 0 : i32
    return %c0_i32, %c0_i32_0 : i32, i32
  }
}

</mosaic_0001>

<bundles_post_ra>
// kernel: int_ram_lstm_forward.1
= control target key start
LH: loop header
LB: loop body
LE: loop exit
PB: predicated region body
PF: predicated region fallthrough
CT: control target
= control target key end

     0   :  { %11 = vsyncpa [#allocation3], 0  ;;  %s1734_s0 = inlined_call_operand.vmem [shape: f32[64,128], index: 0, kind: input, shape index: {}]   ;;  %s1735_s1 = inlined_call_operand.vmem [shape: f32[128,128], index: 1, kind: input, shape index: {}]   ;;  %s1736_s2 = inlined_call_operand.hbm [shape: f32[32,128], index: 2, kind: input, shape index: {}]   ;;  %s1737_s3 = inlined_call_operand.vmem [shape: f32[1,128], index: 3, kind: input, shape index: {}]   ;;  %s1738_s4 = inlined_call_operand.hbm [shape: f32[32,128], index: 4, kind: input, shape index: {}]   ;;  %s1739_s5 = inlined_call_operand.vmem [shape: f32[1,128], index: 5, kind: input, shape index: {}]   ;;  %s1740_s6 = inlined_call_operand.vmem [shape: f32[8,128], index: 6, kind: output, shape index: {}]  }
   0x1   :  { %12 = vsyncpa [#allocation5], 0  ;;  %s1457_s21 = smov [#allocation2]   ;;  %s1409_s25 = scalar_lea.hbm %s1736_s2, 512 }
   0x2   :  { %s22_s22 = sshll.u32 %s1457_s21, 4  ;;  %p1410_p0 = scmp.ne.s32.totalorder %s1736_s2, %s1409_s25  ;;  %s23_s22 = int_to_ptr.vmem [resolvable:$true] %s22_s22 }
   0x3   :  { %p1413_p1 = scmp.lt.u32.totalorder %s1409_s25, %s1736_s2 }
   0x5   :  { %p1415_p2 = pnand %p1413_p1, %p1410_p0 }
   0x7   :  { %1418 = shalt.err (!%p1415_p2)
}
   0x8   :  { %s1419_s30 = scalar_lea.vmem %s23_s22, 512  ;;  %p1424_p4 = scmp.lt.s32.totalorder %s23_s22, %s23_s22 }
   0x9   :  { %p1420_p3 = scmp.ne.s32.totalorder %s23_s22, %s1419_s30  ;;  %p1425_p5 = scmp.lt.s32.totalorder %s1419_s30, %s1419_s30 }
   0xb   :  { %p1426_p6 = por %p1425_p5, %p1424_p4 }
   0xd   :  { %p1427_p7 = pnand %p1426_p6, %p1420_p3 }
   0xf   :  { %1430 = shalt.err (!%p1427_p7)
}
  0x10   :  { %s1458_s7 = smov 128   ;;  %s1459_s8 = smov 8  }
  0x11   :  { %28 = dma.hbm_to_vmem [thread:$0]  %s1736_s2, 512, %s23_s22, [#allocation3], %s1458_s7, %s1458_s7, %s1459_s8  }
  0x12   :  { %s1460_s11 = smov [#allocation4]   ;;  %s1431_s15 = scalar_lea.hbm %s1738_s4, 512 }
  0x13   :  { %s36_s12 = sshll.u32 %s1460_s11, 4  ;;  %p1432_p8 = scmp.ne.s32.totalorder %s1738_s4, %s1431_s15  ;;  %s37_s12 = int_to_ptr.vmem [resolvable:$true] %s36_s12 }
  0x14   :  { %p1435_p9 = scmp.lt.u32.totalorder %s1431_s15, %s1738_s4 }
  0x16   :  { %p1437_p10 = pnand %p1435_p9, %p1432_p8 }
  0x18   :  { %1440 = shalt.err (!%p1437_p10)
}
  0x19   :  { %s1441_s20 = scalar_lea.vmem %s37_s12, 512  ;;  %p1446_p12 = scmp.lt.s32.totalorder %s37_s12, %s37_s12 }
  0x1a   :  { %p1442_p11 = scmp.ne.s32.totalorder %s37_s12, %s1441_s20  ;;  %p1447_p13 = scmp.lt.s32.totalorder %s1441_s20, %s1441_s20 }
  0x1c   :  { %p1448_p0 = por %p1447_p13, %p1446_p12 }
  0x1e   :  { %p1449_p1 = pnand %p1448_p0, %p1442_p11 }
  0x20   :  { %1452 = shalt.err (!%p1449_p1)
}
  0x21   :  { %42 = dma.hbm_to_vmem [thread:$0]  %s1738_s4, 512, %s37_s12, [#allocation5], %s1458_s7, %s1458_s7, %s1459_s8  }
  0x22   :  { %1453 = dma.done.wait [#allocation3], 512  }
  0x23   :  { %1454 = vsyncadd [#allocation3], 4294966784 }
  0x24   :  { %1455 = dma.done.wait [#allocation5], 512  }
  0x25   :  { %1456 = vsyncadd [#allocation5], 4294966784  ;;  %v1461_v0 = vmov 0.0|0.0   ;;  %vm1462_vm0 = vmmov 0   ;;  %v1463_v1 = vmov 0.0   ;;  %v63_v2 = vld [vmem:[%s1735_s1] sm:$0xff]  ;;  %v191_v38 = vlaneseq }
  0x26   :  { %1313 = vmatprep.subr.bf16.mxu1 %v1461_v0  ;;  %1190 = vmatprep.mubr.msk.f32.mxu1 %vm1462_vm0, %v1463_v1  ;;  %v64_v3 = vld [vmem:[%s1735_s1 + $0x8] sm:$0xff]  ;;  %v65_v4 = vld [vmem:[%s1735_s1 + $0x10] sm:$0xff]  ;;  %v66_v6 = vld [vmem:[%s1735_s1 + $0x18] sm:$0xff]  ;;  %v1464_v43 = vmov 0.5   ;;  %s1466_s8 = smov 32   ;;  %vm198_vm4 = vcmask 261120  }
  0x27   :  { %v1281_v5 = vpack.c.bf16 %v64_v3, %v63_v2  ;;  %v1285_v7 = vpack.c.bf16 %v66_v6, %v65_v4  ;;  %v67_v8 = vld [vmem:[%s1735_s1 + $0x20] sm:$0xff]  ;;  %v68_v9 = vld [vmem:[%s1735_s1 + $0x28] sm:$0xff]  ;;  %v69_v12 = vld [vmem:[%s1735_s1 + $0x30] sm:$0xff]  ;;  %v192_v42 = vand.u32 127, %v191_v38 }
  0x28   :  { %v51_v10 = vld [vmem:[#allocation2] sm:$0xff]  ;;  %v1289_v11 = vpack.c.bf16 %v68_v9, %v67_v8  ;;  %v70_v13 = vld [vmem:[%s1735_s1 + $0x38] sm:$0xff]  ;;  %v52_v14 = vld [vmem:[#allocation2 + $0x8] sm:$0xff] }
  0x29   :  { %1282 = vmatprep.subr.bf16.mxu0 %v1281_v5  ;;  %v1553_v15 = vpack.c.bf16 %v52_v14, %v51_v10  ;;  %v55_v16 = vld [vmem:[%s1734_s0] sm:$0xff]  ;;  %v53_v17 = vld [vmem:[#allocation2 + $0x10] sm:$0xff]  ;;  %v54_v18 = vld [vmem:[#allocation2 + $0x18] sm:$0xff]  ;;  %v1293_v20 = vpack.c.bf16 %v70_v13, %v69_v12  ;;  %vm193_vm1 = vcmp.ge.s32.totalorder %v192_v42, 64  ;;  %vm194_vm2 = vcmp.lt.s32.totalorder %v192_v42, 96 }
  0x2a   :  { %1284 = vmatpush3.bf16.msra.mxu0 %v1281_v5  ;;  %1170 = vmatprep.mubr.f32.mxu0 %v55_v16  ;;  %v1559_v19 = vpack.c.bf16 %v54_v18, %v53_v17  ;;  %v71_v21 = vld [vmem:[%s1735_s1 + $0x40] sm:$0xff]  ;;  %v72_v22 = vld [vmem:[%s1735_s1 + $0x48] sm:$0xff]  ;;  %v73_v24 = vld [vmem:[%s1735_s1 + $0x50] sm:$0xff] }
  0x2b   :  { %1286 = vmatprep.subr.bf16.mxu0 %v1285_v7  ;;  %1315 = vmatpush3.bf16.msra.mxu1 %v1553_v15  ;;  %v1297_v23 = vpack.c.bf16 %v72_v22, %v71_v21  ;;  %v74_v25 = vld [vmem:[%s1735_s1 + $0x58] sm:$0xff]  ;;  %v75_v27 = vld [vmem:[%s1735_s1 + $0x60] sm:$0xff]  ;;  %v76_v28 = vld [vmem:[%s1735_s1 + $0x68] sm:$0xff] }
  0x2c   :  { %1316 = vmatprep.subr.bf16.mxu1 %v1461_v0  ;;  %v1301_v26 = vpack.c.bf16 %v74_v25, %v73_v24  ;;  %v1305_v29 = vpack.c.bf16 %v76_v28, %v75_v27  ;;  %v77_v30 = vld [vmem:[%s1735_s1 + $0x70] sm:$0xff]  ;;  %v78_v31 = vld [vmem:[%s1735_s1 + $0x78] sm:$0xff]  ;;  %v56_v33 = vld [vmem:[%s1734_s0 + $0x8] sm:$0xff] }
  0x2d   :  { %v1309_v32 = vpack.c.bf16 %v78_v31, %v77_v30  ;;  %v1606_v36 = vld [vmem:[%s1737_s3] ss:$0 sm:$0xff]  ;;  %vm195_vm3 = vmand %vm193_vm1, %vm194_vm2  ;;  %s1465_s3 = smov 64   ;;  %v57_v8 = vld [vmem:[%s1734_s0 + $0x10] sm:$0xff] }
  0x2e   :  { %1288 = vmatpush3.bf16.msra.mxu0 %v1285_v7  ;;  %v1609_v44 = vsel %vm195_vm3, 1.0, %v1464_v43  ;;  %v1611_v46 = vsel %vm195_vm3, 0.0, %v1464_v43  ;;  %v58_v9 = vld [vmem:[%s1734_s0 + $0x18] sm:$0xff] }
  0x2f   :  { %1290 = vmatprep.subr.bf16.mxu0 %v1289_v11  ;;  %1318 = vmatpush3.bf16.msra.mxu1 %v1559_v19 }
  0x30   :  { %1319 = vmatprep.subr.bf16.mxu1 %v1461_v0 }
  0x32   :  { %1292 = vmatpush3.bf16.msra.mxu0 %v1289_v11  ;;  %1191 = vmatmul.mubr.f32.vlgmr.msra.gmra.mrb[0].mxu1 %v1463_v1 }
  0x33   :  { %1294 = vmatprep.subr.bf16.mxu0 %v1293_v20  ;;  %1321 = vmatpush3.bf16.msra.mxu1 %v1553_v15 }
  0x34   :  { %1322 = vmatprep.subr.bf16.mxu1 %v1461_v0  ;;  %1201 = vmatprep.mubr.msk.f32.mxu1 %vm1462_vm0, %v1463_v1 }
  0x36   :  { %1296 = vmatpush3.bf16.msra.mxu0 %v1293_v20 }
  0x37   :  { %1298 = vmatprep.subr.bf16.mxu0 %v1297_v23  ;;  %1324 = vmatpush3.bf16.msra.mxu1 %v1559_v19 }
  0x38   :  { %1325 = vmatprep.subr.bf16.mxu1 %v1461_v0 }
  0x3a   :  { %1300 = vmatpush3.bf16.msra.mxu0 %v1297_v23 }
  0x3b   :  { %1302 = vmatprep.subr.bf16.mxu0 %v1301_v26 }
  0x3e   :  { %1304 = vmatpush3.bf16.msra.mxu0 %v1301_v26 }
  0x3f   :  { %1306 = vmatprep.subr.bf16.mxu0 %v1305_v29 }
  0x42   :  { %1308 = vmatpush3.bf16.msra.mxu0 %v1305_v29 }
  0x43   :  { %1310 = vmatprep.subr.bf16.mxu0 %v1309_v32 }
  0x46   :  { %1312 = vmatpush3.bf16.msra.mxu0 %v1309_v32 }
  0x47   :  { %1343 = vmatprep.subr.bf16.mxu0 %v1461_v0 }
  0x49   :  { %1171 = vmatmul.mubr.f32.vlgmr.msra.gmra.mrb[0].mxu0 %v56_v33 }
  0x4a   :  { %1345 = vmatpush3.bf16.msra.mxu0 %v1553_v15  ;;  %1173 = vmatprep.mubr.f32.mxu0 %v57_v8  ;;  %v62_v8 = vld [vmem:[%s1734_s0 + $0x38] sm:$0xff] }
  0x4b   :  { %1346 = vmatprep.subr.bf16.mxu0 %v1461_v0 }
  0x4d   :  { %1174 = vmatmul.mubr.f32.gmra.mrb[2].mxu0 %v58_v9 }
  0x4e   :  { %1348 = vmatpush3.bf16.msra.mxu0 %v1559_v19 }
  0x4f   :  { %1355 = vmatprep.subr.bf16.mxu0 %v1461_v0 }
 0x105   :  { %v268_v34 = vpop.f32.mrb[0].mxu1 }
 0x106   :  { %v1192_v35 = vpop.f32.mrb[1].mxu1 }
 0x11c   :  { %v1172_v37 = vpop.f32.mrb[0].mxu0 }
 0x11d   :  { %v152_v39 = vpop.f32.mrb[1].mxu0  ;;  %v158_v58 = vadd.f32 %v1172_v37, %v1606_v36 }
 0x11e   :  { %v153_v40 = vadd.f32 %v1606_v36, %v152_v39 }
 0x120   :  { %v272_v41 = vadd.f32 %v268_v34, %v153_v40  ;;  %v1175_v13 = vpop.f32.mrb[2].mxu0 }
 0x121   :  { %v162_v14 = vpop.f32.mrb[3].mxu0  ;;  %v168_v34 = vadd.f32 %v1175_v13, %v1606_v36 }
 0x122   :  { %1377 = vtanh.f32 %v272_v41  ;;  %v163_v17 = vadd.f32 %v1606_v36, %v162_v14 }
 0x12c   :  { %v1378_v45 = vpop.eup %1377 }
 0x12d   :  { %v274_v47 = vmul.f32 %v1378_v45, %v1609_v44 }
 0x12f   :  { %v275_v48 = vadd.f32 %v274_v47, %v1611_v46 }
 0x131   :  { %278 = vrot.lane.b32.xlu0 %v275_v48, %s1465_s3  ;;  %v276_v51 = vmul.f32 0.0, %v275_v48 }
 0x1a3   :  { %v279_v49 = vpop.permute.xlu0 %278 }
 0x1a4   :  { %v281_v50 = vmul.f32 %v279_v49, %v275_v48  ;;  %v59_v49 = vld [vmem:[%s1734_s0 + $0x20] sm:$0xff] }
 0x1a5   :  { %1176 = vmatprep.mubr.f32.mxu0 %v59_v49 }
 0x1a6   :  { %283 = vrot.lane.b32.xlu0 %v281_v50, %s1466_s8  ;;  %v60_v50 = vld [vmem:[%s1734_s0 + $0x28] sm:$0xff] }
 0x1a7   :  { %1177 = vmatmul.mubr.f32.gmra.mrb[4].mxu0 %v60_v50 }
 0x218   :  { %v284_v52 = vpop.permute.xlu0 %283 }
 0x219   :  { %v286_v53 = vadd.f32 %v284_v52, %v276_v51 }
 0x21b   :  { %1379 = vtanh.f32 %v286_v53 }
 0x225   :  { %v1380_v54 = vpop.eup %1379 }
 0x226   :  { %289 = vrot.lane.b32.xlu1 %v1380_v54, %s1465_s3 }
 0x27a   :  { %v1178_v54 = vpop.f32.mrb[4].mxu0 }
 0x298   :  { %v290_v55 = vpop.permute.xlu1 %289 }
 0x299   :  { %v292_v56 = vmul.f32 %v290_v55, %v275_v48  ;;  %v172_v55 = vpop.f32.mrb[5].mxu0 }
 0x29b   :  { %294 = vrot.lane.b32.xlu1 %v292_v56, %s1466_s8 }
 0x30d   :  { %v295_v57 = vpop.permute.xlu1 %294 }
 0x30e   :  { %1202 = vmatmul.mubr.msk.f32.vlgmr.msra.gmra.mrb[2].mxu1 %vm198_vm4, %v295_v57  ;;  %v173_v57 = vadd.f32 %v1606_v36, %v172_v55 }
 0x30f   :  { %1327 = vmatpush3.bf16.msra.mxu1 %v1553_v15  ;;  %1212 = vmatprep.mubr.msk.f32.mxu1 %vm1462_vm0, %v1463_v1 }
 0x310   :  { %1328 = vmatprep.subr.bf16.mxu1 %v1461_v0 }
 0x313   :  { %1330 = vmatpush3.bf16.msra.mxu1 %v1559_v19 }
 0x314   :  { %1331 = vmatprep.subr.bf16.mxu1 %v1461_v0 }
 0x3e1   :  { %v364_v59 = vpop.f32.mrb[2].mxu1 }
 0x3e2   :  { %v368_v60 = vadd.f32 %v364_v59, %v158_v58  ;;  %v1203_v61 = vpop.f32.mrb[3].mxu1 }
 0x3e4   :  { %1381 = vtanh.f32 %v368_v60 }
 0x3ee   :  { %v1382_v62 = vpop.eup %1381 }
 0x3ef   :  { %v370_v63 = vmul.f32 %v1382_v62, %v1609_v44 }
 0x3f1   :  { %v371_v2 = vadd.f32 %v370_v63, %v1611_v46 }
 0x3f3   :  { %374 = vrot.lane.b32.xlu0 %v371_v2, %s1465_s3  ;;  %v372_v5 = vmul.f32 %v371_v2, %v286_v53 }
 0x465   :  { %v375_v3 = vpop.permute.xlu0 %374 }
 0x466   :  { %v377_v4 = vmul.f32 %v375_v3, %v371_v2 }
 0x468   :  { %379 = vrot.lane.b32.xlu1 %v377_v4, %s1466_s8 }
 0x4da   :  { %v380_v6 = vpop.permute.xlu1 %379 }
 0x4db   :  { %v382_v7 = vadd.f32 %v380_v6, %v372_v5 }
 0x4dd   :  { %1383 = vtanh.f32 %v382_v7 }
 0x4e7   :  { %v1384_v10 = vpop.eup %1383 }
 0x4e8   :  { %385 = vrot.lane.b32.xlu0 %v1384_v10, %s1465_s3 }
 0x55a   :  { %v386_v11 = vpop.permute.xlu0 %385 }
 0x55b   :  { %v388_v12 = vmul.f32 %v386_v11, %v371_v2 }
 0x55d   :  { %390 = vrot.lane.b32.xlu1 %v388_v12, %s1466_s8 }
 0x5cf   :  { %v391_v16 = vpop.permute.xlu1 %390 }
 0x5d0   :  { %1213 = vmatmul.mubr.msk.f32.vlgmr.msra.gmra.mrb[4].mxu1 %vm198_vm4, %v391_v16  ;;  %v178_v16 = vadd.f32 %v1178_v54, %v1606_v36 }
 0x5d1   :  { %1333 = vmatpush3.bf16.msra.mxu1 %v1553_v15  ;;  %1223 = vmatprep.mubr.msk.f32.mxu1 %vm1462_vm0, %v1463_v1 }
 0x5d2   :  { %1334 = vmatprep.subr.bf16.mxu1 %v1461_v0 }
 0x5d5   :  { %1336 = vmatpush3.bf16.msra.mxu1 %v1559_v19 }
 0x5d6   :  { %1337 = vmatprep.subr.bf16.mxu1 %v1461_v0 }
 0x6a3   :  { %v460_v18 = vpop.f32.mrb[4].mxu1 }
 0x6a4   :  { %v464_v20 = vadd.f32 %v460_v18, %v163_v17  ;;  %v1214_v21 = vpop.f32.mrb[5].mxu1 }
 0x6a6   :  { %1385 = vtanh.f32 %v464_v20 }
 0x6b0   :  { %v1386_v22 = vpop.eup %1385 }
 0x6b1   :  { %v466_v23 = vmul.f32 %v1386_v22, %v1609_v44 }
 0x6b3   :  { %v467_v24 = vadd.f32 %v466_v23, %v1611_v46 }
 0x6b5   :  { %470 = vrot.lane.b32.xlu0 %v467_v24, %s1465_s3  ;;  %v468_v27 = vmul.f32 %v467_v24, %v382_v7  ;;  %v61_v7 = vld [vmem:[%s1734_s0 + $0x30] sm:$0xff] }
 0x6b6   :  { %1179 = vmatprep.mubr.f32.mxu0 %v61_v7  ;;  %v1067_v7 = vld [vmem:[%s1739_s5] ss:$0 sm:$0xff] }
 0x6b7   :  { %1180 = vmatmul.mubr.f32.gmra.mrb[6].mxu0 %v62_v8 }
 0x6b8   :  { %1245 = vmatprep.mubr.msk.f32.mxu0 %vm1462_vm0, %v1463_v1 }
 0x727   :  { %v471_v25 = vpop.permute.xlu0 %470 }
 0x728   :  { %v473_v26 = vmul.f32 %v471_v25, %v467_v24 }
 0x72a   :  { %475 = vrot.lane.b32.xlu1 %v473_v26, %s1466_s8 }
 0x78a   :  { %v1181_v12 = vpop.f32.mrb[6].mxu0 }
 0x78b   :  { %v182_v13 = vpop.f32.mrb[7].mxu0  ;;  %v188_v49 = vadd.f32 %v1181_v12, %v1606_v36 }
 0x79c   :  { %v476_v28 = vpop.permute.xlu1 %475 }
 0x79d   :  { %v478_v29 = vadd.f32 %v476_v28, %v468_v27 }
 0x79f   :  { %1387 = vtanh.f32 %v478_v29 }
 0x7a9   :  { %v1388_v30 = vpop.eup %1387 }
 0x7aa   :  { %481 = vrot.lane.b32.xlu0 %v1388_v30, %s1465_s3 }
 0x81c   :  { %v482_v31 = vpop.permute.xlu0 %481 }
 0x81d   :  { %v484_v32 = vmul.f32 %v482_v31, %v467_v24  ;;  %v183_v31 = vadd.f32 %v1606_v36, %v182_v13  ;;  %v966_v36 = vld [vmem:[#allocation4] sm:$0xff] }
 0x81f   :  { %486 = vrot.lane.b32.xlu1 %v484_v32, %s1466_s8 }
 0x891   :  { %v487_v33 = vpop.permute.xlu1 %486 }
 0x892   :  { %1224 = vmatmul.mubr.msk.f32.vlgmr.msra.gmra.mrb[6].mxu1 %vm198_vm4, %v487_v33 }
 0x893   :  { %1339 = vmatpush3.bf16.msra.mxu1 %v1553_v15  ;;  %1234 = vmatprep.mubr.msk.f32.mxu1 %vm1462_vm0, %v1463_v1 }
 0x894   :  { %1340 = vmatprep.subr.bf16.mxu1 %v1461_v0 }
 0x897   :  { %1342 = vmatpush3.bf16.msra.mxu1 %v1559_v19 }
 0x898   :  { %1349 = vmatprep.subr.bf16.mxu1 %v1461_v0 }
 0x965   :  { %v556_v35 = vpop.f32.mrb[6].mxu1 }
 0x966   :  { %v560_v37 = vadd.f32 %v556_v35, %v168_v34  ;;  %v1225_v38 = vpop.f32.mrb[7].mxu1 }
 0x968   :  { %1389 = vtanh.f32 %v560_v37 }
 0x972   :  { %v1390_v39 = vpop.eup %1389 }
 0x973   :  { %v562_v40 = vmul.f32 %v1390_v39, %v1609_v44 }
 0x975   :  { %v563_v41 = vadd.f32 %v562_v40, %v1611_v46 }
 0x977   :  { %566 = vrot.lane.b32.xlu0 %v563_v41, %s1465_s3  ;;  %v564_v45 = vmul.f32 %v563_v41, %v478_v29 }
 0x9e9   :  { %v567_v42 = vpop.permute.xlu0 %566 }
 0x9ea   :  { %v569_v43 = vmul.f32 %v567_v42, %v563_v41 }
 0x9ec   :  { %571 = vrot.lane.b32.xlu1 %v569_v43, %s1466_s8 }
 0xa5e   :  { %v572_v47 = vpop.permute.xlu1 %571 }
 0xa5f   :  { %v574_v48 = vadd.f32 %v572_v47, %v564_v45 }
 0xa61   :  { %1391 = vtanh.f32 %v574_v48 }
 0xa6b   :  { %v1392_v51 = vpop.eup %1391 }
 0xa6c   :  { %577 = vrot.lane.b32.xlu0 %v1392_v51, %s1465_s3 }
 0xade   :  { %v578_v52 = vpop.permute.xlu0 %577 }
 0xadf   :  { %v580_v53 = vmul.f32 %v578_v52, %v563_v41 }
 0xae1   :  { %582 = vrot.lane.b32.xlu1 %v580_v53, %s1466_s8 }
 0xb53   :  { %v583_v56 = vpop.permute.xlu1 %582 }
 0xb54   :  { %1235 = vmatmul.mubr.msk.f32.vlgmr.msra.gmra.mrb[8].mxu1 %vm198_vm4, %v583_v56 }
 0xb55   :  { %1351 = vmatpush3.bf16.msra.mxu1 %v1553_v15  ;;  %1256 = vmatprep.mubr.msk.f32.mxu1 %vm1462_vm0, %v1463_v1 }
 0xb56   :  { %1352 = vmatprep.subr.bf16.mxu1 %v1461_v0 }
 0xb59   :  { %1354 = vmatpush3.bf16.msra.mxu1 %v1559_v19 }
 0xb5a   :  { %1361 = vmatprep.subr.bf16.mxu1 %v1461_v0 }
 0xc27   :  { %v652_v58 = vpop.f32.mrb[8].mxu1 }
 0xc28   :  { %v656_v59 = vadd.f32 %v652_v58, %v173_v57  ;;  %v1236_v60 = vpop.f32.mrb[9].mxu1 }
 0xc2a   :  { %1393 = vtanh.f32 %v656_v59 }
 0xc34   :  { %v1394_v61 = vpop.eup %1393 }
 0xc35   :  { %v658_v62 = vmul.f32 %v1394_v61, %v1609_v44  ;;  %v967_v61 = vld [vmem:[#allocation4 + $0x8] sm:$0xff] }
 0xc37   :  { %v659_v63 = vadd.f32 %v658_v62, %v1611_v46  ;;  %v968_v62 = vld [vmem:[#allocation4 + $0x10] sm:$0xff] }
 0xc39   :  { %662 = vrot.lane.b32.xlu0 %v659_v63, %s1465_s3  ;;  %v660_v4 = vmul.f32 %v659_v63, %v574_v48 }
 0xcab   :  { %v663_v2 = vpop.permute.xlu0 %662 }
 0xcac   :  { %v665_v3 = vmul.f32 %v663_v2, %v659_v63  ;;  %v969_v2 = vld [vmem:[#allocation4 + $0x18] sm:$0xff] }
 0xcae   :  { %667 = vrot.lane.b32.xlu1 %v665_v3, %s1466_s8  ;;  %v1365_v3 = vpack.c.bf16 %v969_v2, %v968_v62 }
 0xd20   :  { %v668_v5 = vpop.permute.xlu1 %667 }
 0xd21   :  { %v670_v6 = vadd.f32 %v668_v5, %v660_v4 }
 0xd23   :  { %1395 = vtanh.f32 %v670_v6 }
 0xd2d   :  { %v1396_v9 = vpop.eup %1395 }
 0xd2e   :  { %673 = vrot.lane.b32.xlu0 %v1396_v9, %s1465_s3 }
 0xda0   :  { %v674_v10 = vpop.permute.xlu0 %673 }
 0xda1   :  { %v676_v11 = vmul.f32 %v674_v10, %v659_v63  ;;  %v1362_v63 = vpack.c.bf16 %v967_v61, %v966_v36 }
 0xda3   :  { %678 = vrot.lane.b32.xlu1 %v676_v11, %s1466_s8 }
 0xe15   :  { %v679_v14 = vpop.permute.xlu1 %678 }
 0xe16   :  { %1246 = vmatmul.mubr.msk.f32.vlgmr.msra.gmra.mrb[8].mxu0 %vm198_vm4, %v679_v14 }
 0xe17   :  { %1357 = vmatpush3.bf16.msra.mxu0 %v1553_v15  ;;  %1267 = vmatprep.mubr.msk.f32.mxu0 %vm1462_vm0, %v1463_v1 }
 0xe18   :  { %1358 = vmatprep.subr.bf16.mxu0 %v1461_v0 }
 0xe1b   :  { %1360 = vmatpush3.bf16.msra.mxu0 %v1559_v19 }
 0xee9   :  { %v748_v17 = vpop.f32.mrb[8].mxu0 }
 0xeea   :  { %v752_v18 = vadd.f32 %v748_v17, %v178_v16  ;;  %v1247_v20 = vpop.f32.mrb[9].mxu0 }
 0xeec   :  { %1397 = vtanh.f32 %v752_v18 }
 0xef6   :  { %v1398_v21 = vpop.eup %1397 }
 0xef7   :  { %v754_v22 = vmul.f32 %v1398_v21, %v1609_v44 }
 0xef9   :  { %v755_v23 = vadd.f32 %v754_v22, %v1611_v46 }
 0xefb   :  { %758 = vrot.lane.b32.xlu0 %v755_v23, %s1465_s3  ;;  %v756_v25 = vmul.f32 %v755_v23, %v670_v6 }
 0xf6d   :  { %v759_v15 = vpop.permute.xlu0 %758 }
 0xf6e   :  { %v761_v24 = vmul.f32 %v759_v15, %v755_v23 }
 0xf70   :  { %763 = vrot.lane.b32.xlu1 %v761_v24, %s1466_s8 }
 0xfe2   :  { %v764_v26 = vpop.permute.xlu1 %763 }
 0xfe3   :  { %v766_v19 = vadd.f32 %v764_v26, %v756_v25 }
 0xfe5   :  { %1399 = vtanh.f32 %v766_v19 }
 0xfef   :  { %v1400_v27 = vpop.eup %1399 }
 0xff0   :  { %769 = vrot.lane.b32.xlu0 %v1400_v27, %s1465_s3 }
0x1062   :  { %v770_v28 = vpop.permute.xlu0 %769 }
0x1063   :  { %v772_v29 = vmul.f32 %v770_v28, %v755_v23 }
0x1065   :  { %774 = vrot.lane.b32.xlu1 %v772_v29, %s1466_s8 }
0x10d7   :  { %v775_v30 = vpop.permute.xlu1 %774 }
0x10d8   :  { %1257 = vmatmul.mubr.msk.f32.vlgmr.msra.gmra.mrb[10].mxu1 %vm198_vm4, %v775_v30 }
0x10d9   :  { %1278 = vmatprep.mubr.msk.f32.mxu1 %vm1462_vm0, %v1463_v1  ;;  %1363 = vmatpush3.bf16.msra.mxu1 %v1362_v63 }
0x10da   :  { %1364 = vmatprep.subr.bf16.mxu1 %v1461_v0 }
0x10dd   :  { %1366 = vmatpush3.bf16.msra.mxu1 %v1365_v3 }
0x11ab   :  { %v844_v32 = vpop.f32.mrb[10].mxu1 }
0x11ac   :  { %v848_v33 = vadd.f32 %v844_v32, %v183_v31  ;;  %v1258_v34 = vpop.f32.mrb[11].mxu1 }
0x11ae   :  { %1401 = vtanh.f32 %v848_v33 }
0x11b8   :  { %v1402_v35 = vpop.eup %1401 }
0x11b9   :  { %v850_v37 = vmul.f32 %v1402_v35, %v1609_v44 }
0x11bb   :  { %v851_v38 = vadd.f32 %v850_v37, %v1611_v46 }
0x11bd   :  { %854 = vrot.lane.b32.xlu0 %v851_v38, %s1465_s3  ;;  %v852_v41 = vmul.f32 %v851_v38, %v766_v19 }
0x122f   :  { %v855_v39 = vpop.permute.xlu0 %854 }
0x1230   :  { %v857_v40 = vmul.f32 %v855_v39, %v851_v38 }
0x1232   :  { %859 = vrot.lane.b32.xlu1 %v857_v40, %s1466_s8 }
0x12a4   :  { %v860_v42 = vpop.permute.xlu1 %859 }
0x12a5   :  { %v862_v1 = vadd.f32 %v860_v42, %v852_v41 }
0x12a7   :  { %1403 = vtanh.f32 %v862_v1 }
0x12b1   :  { %v1404_v43 = vpop.eup %1403 }
0x12b2   :  { %865 = vrot.lane.b32.xlu0 %v1404_v43, %s1465_s3 }
0x1324   :  { %v866_v45 = vpop.permute.xlu0 %865 }
0x1325   :  { %v868_v47 = vmul.f32 %v866_v45, %v851_v38 }
0x1327   :  { %870 = vrot.lane.b32.xlu1 %v868_v47, %s1466_s8 }
0x1399   :  { %v871_v48 = vpop.permute.xlu1 %870 }
0x139a   :  { %1268 = vmatmul.mubr.msk.f32.vlgmr.msra.gmra.mrb[10].mxu0 %vm198_vm4, %v871_v48 }
0x146d   :  { %v940_v50 = vpop.f32.mrb[10].mxu0 }
0x146e   :  { %v944_v51 = vadd.f32 %v940_v50, %v188_v49  ;;  %v1269_v52 = vpop.f32.mrb[11].mxu0 }
0x1470   :  { %1405 = vtanh.f32 %v944_v51 }
0x147a   :  { %v1406_v53 = vpop.eup %1405 }
0x147b   :  { %v946_v54 = vmul.f32 %v1406_v53, %v1609_v44 }
0x147d   :  { %v947_v55 = vadd.f32 %v946_v54, %v1611_v46 }
0x147f   :  { %950 = vrot.lane.b32.xlu0 %v947_v55, %s1465_s3  ;;  %v948_v58 = vmul.f32 %v947_v55, %v862_v1 }
0x14f1   :  { %v951_v56 = vpop.permute.xlu0 %950 }
0x14f2   :  { %v953_v57 = vmul.f32 %v951_v56, %v947_v55 }
0x14f4   :  { %955 = vrot.lane.b32.xlu1 %v953_v57, %s1466_s8 }
0x1566   :  { %v956_v59 = vpop.permute.xlu1 %955 }
0x1567   :  { %v958_v60 = vadd.f32 %v956_v59, %v948_v58 }
0x1569   :  { %1407 = vtanh.f32 %v958_v60 }
0x1573   :  { %v1408_v44 = vpop.eup %1407 }
0x1574   :  { %961 = vrot.lane.b32.xlu0 %v1408_v44, %s1465_s3 }
0x15e6   :  { %v962_v46 = vpop.permute.xlu0 %961 }
0x15e7   :  { %v964_v4 = vmul.f32 %v962_v46, %v947_v55 }
0x15e9   :  { %v965_v5 = vmax.f32 %v964_v4, 0.0 }
0x15eb   :  { %978 = vrot.lane.b32.xlu1 %v965_v5, %s1466_s8 }
0x165d   :  { %v979_v6 = vpop.permute.xlu1 %978 }
0x165e   :  { %1279 = vmatmul.mubr.msk.f32.vlgmr.msra.gmra.mrb[12].mxu1 %vm198_vm4, %v979_v6 }
0x1731   :  { %v1048_v8 = vpop.f32.mrb[12].mxu1 }
0x1732   :  { %v1049_v9 = vadd.f32 %v1067_v7, %v1048_v8  ;;  %v1280_v10 = vpop.f32.mrb[13].mxu1 }
0x1734   :  { %1052 = vst [vmem:[%s1740_s6] sm:$0xff] %v1049_v9 }
0x1735   :  { %1057 = vsyncpa [#allocation3], 1 }
0x1736   :  { %1058 = vsyncpa [#allocation5], 1 }

</bundles_post_ra>
